<compile_context>
chip_gen: v5e
topology: v5e:2x2
jax: 0.10.0
libtpu: 0.0.40
codegen_flags: <defaults>
</compile_context>

<pallas_src>
import jax
import jax.numpy as jnp
from jax.experimental import pallas as pl
from jax.experimental.pallas import tpu as pltpu


def _pos_embed_kernel(w_ref, o_ref):
    # w_ref: (1, L) flattened embedding table, resident in VMEM (single copy).
    # o_ref: (Bb, L) lane-dense output block; broadcast table across batch rows.
    o_ref[...] = jnp.broadcast_to(w_ref[...], o_ref.shape)


def positional_embedding_forward(x, weight, *, target_block_bytes=2 * 1024 * 1024):
    """Pallas equivalent of PositionalEmbedding.forward.

    Args:
      x: array whose leading dim is the batch size (contents unused, matching
         the PyTorch module).
      weight: (max_len, d_model) embedding table.

    Returns:
      (batch, max_len, d_model) array: weight repeated along batch.
    """
    batch = x.shape[0]
    max_len, d_model = weight.shape
    L = max_len * d_model
    itemsize = weight.dtype.itemsize

    # Lane-dense flat views: kernel works on (batch, L); reshape back after.
    # For very large tables (L*4B approaching the VMEM budget, esp. v7x 64 MiB)
    # this spec would need to tile over max_len instead of keeping the whole
    # table resident; not needed at this module's scale.
    w_flat = weight.reshape(1, L)

    # Coarsen the grid: group batch rows so each output block is ~target size.
    row_bytes = L * itemsize
    bb = max(1, target_block_bytes // row_bytes)
    if bb >= batch:
        bb = batch                                   # single block covers the batch
    else:
        bb = min(max(8, (bb // 8) * 8), batch)       # keep sublane (8) alignment
    num_blocks = pl.cdiv(batch, bb)

    # VMEM budget: resident weight + double-buffered output blocks (+ margin).
    out_block_bytes = bb * row_bytes
    vmem_needed = L * itemsize + 2 * out_block_bytes
    vmem_limit = int(min(max(vmem_needed + (4 << 20), 16 << 20), 48 << 20))

    out_flat = pl.pallas_call(
        _pos_embed_kernel,
        out_shape=jax.ShapeDtypeStruct((batch, L), weight.dtype),
        grid_spec=pltpu.PrefetchScalarGridSpec(
            num_scalar_prefetch=0,
            grid=(num_blocks,),
            in_specs=[
                # Whole (tiny) table placed in VMEM once, single-buffered.
                pl.BlockSpec(memory_space=pltpu.MemorySpace.VMEM),
            ],
            out_specs=pl.BlockSpec((bb, L), lambda b: (b, 0)),
        ),
        compiler_params=pltpu.CompilerParams(
            dimension_semantics=("parallel",),
            vmem_limit_bytes=vmem_limit,
        ),
        cost_estimate=pl.CostEstimate(
            flops=0,
            transcendentals=0,
            bytes_accessed=L * itemsize * (1 + batch),  # read table + write B copies
        ),
    )(w_flat)

    return out_flat.reshape(batch, max_len, d_model)


if __name__ == "__main__":
    # Module config (small, consistent with the forward): max_len=8, d_model=32
    max_len, d_model = 8, 32
    batch, seq = 2, 8  # x is (batch, seq); only batch is used by forward

    key = jax.random.PRNGKey(0)
    kw, kx = jax.random.split(key)

    # nn.Embedding default init: weight ~ N(0, 1)
    weight = jax.random.normal(kw, (max_len, d_model), dtype=jnp.float32)
    # x contents are irrelevant to forward (only batch size is used)
    x = jax.random.randint(kx, (batch, seq), 0, max_len, dtype=jnp.int32)

    out = positional_embedding_forward(x, weight)
    out = jax.block_until_ready(out)

    # Reference check: repeat weight along a new batch axis
    ref = jnp.broadcast_to(weight[None], (batch, max_len, d_model))
    assert out.shape == (batch, max_len, d_model), out.shape
    assert out.dtype == weight.dtype
    assert jnp.allclose(out, ref), "mismatch vs reference broadcast"

    print("KERNEL_OK")
</pallas_src>

<mosaic_0001>
module attributes {stable_mosaic.version = 11 : i64} {
  func.func @_pos_embed_kernel(%arg0: i32, %arg1: memref<1x256xf32, #tpu.memory_space<vmem>>, %arg2: memref<2x256xf32, #tpu.memory_space<vmem>>) attributes {dimension_semantics = [#tpu.dimension_semantics<parallel>], iteration_bounds = array<i64: 1>, scalar_prefetch = 0 : i64, scratch_operands = 0 : i64, tpu.core_type = #tpu.core_type<tc>, window_params = [{pipeline_mode = #tpu.pipeline_mode<synchronous>, transform_indices = @transform_0, window_bounds = array<i64: 1, 256>}, {transform_indices = @transform_1, window_bounds = array<i64: 2, 256>}]} {
    %c0 = arith.constant 0 : index
    %c0_0 = arith.constant 0 : index
    %0 = vector.load %arg1[%c0, %c0_0] : memref<1x256xf32, #tpu.memory_space<vmem>>, vector<1x256xf32>
    %1 = vector.shape_cast %0 : vector<1x256xf32> to vector<1x256xf32>
    %2 = vector.broadcast %1 : vector<1x256xf32> to vector<2x256xf32>
    %c0_1 = arith.constant 0 : index
    %c0_2 = arith.constant 0 : index
    %3 = vector.load %arg2[%c0_1, %c0_2] : memref<2x256xf32, #tpu.memory_space<vmem>>, vector<2x256xf32>
    tpu.vector_store %arg2[%c0_1, %c0_2], %2 {strides = array<i32>} : memref<2x256xf32, #tpu.memory_space<vmem>>, vector<2x256xf32>,
    return
  }
  func.func @transform_0(%arg0: i32) -> (i32, i32) {
    %c0_i32 = arith.constant 0 : i32
    %c0_i32_0 = arith.constant 0 : i32
    %c0_i32_1 = arith.constant 0 : i32
    return %c0_i32, %c0_i32_0 : i32, i32
  }
  func.func @transform_1(%arg0: i32) -> (i32, i32) {
    %c0_i32 = arith.constant 0 : i32
    %c0_i32_0 = arith.constant 0 : i32
    return %arg0, %c0_i32 : i32, i32
  }
}

</mosaic_0001>

<bundles_post_ra>
// kernel: tpu_custom_call.1
= control target key start
LH: loop header
LB: loop body
LE: loop exit
PB: predicated region body
PF: predicated region fallthrough
CT: control target
= control target key end

     0   :  { %6 = vsyncpa [#allocation3], 0  ;;  %s121_s0 = inlined_call_operand.hbm [shape: f32[1,256], index: 0, kind: input, shape index: {}]   ;;  %s122_s1 = inlined_call_operand.hbm [shape: f32[2,256], index: 1, kind: output, shape index: {}]  }
   0x1   :  { %7 = vsyncpa [#allocation4], 0  ;;  %s13_s8 = sshll.u32 %s121_s0, 4  ;;  %s103_s9 = smov [#allocation2]   ;;  %s14_s8 = int_to_ptr.hbm [resolvable:$true] %s13_s8 }
   0x2   :  { %s15_s10 = sshll.u32 %s103_s9, 4  ;;  %s16_s10 = int_to_ptr.vmem [resolvable:$true] %s15_s10 }
   0x3   :  { %18 = dma.hbm_to_vmem [thread:$0]  %s14_s8, 32, %s16_s10, [#allocation3]  }
   0x4   :  { %99 = dma.done.wait [#allocation3], 32  }
   0x5   :  { %100 = vsyncadd [#allocation3], 4294967264  ;;  %v23_v0 = vld [vmem:[#allocation2] sm:$0x3]  ;;  %s104_s11 = smov [#allocation5]   ;;  %s39_s15 = sshll.u32 %s122_s1, 4  ;;  %s40_s15 = int_to_ptr.hbm [resolvable:$true] %s39_s15 }
   0x6   :  { %v25_v1 = vperm.slane %v23_v0, 0  ;;  %v26_v2 = vperm.slane %v23_v0, 1  ;;  %s37_s12 = sshll.u32 %s104_s11, 4  ;;  %vm28_vm0 = vcmask 1041408   ;;  %s38_s12 = int_to_ptr.vmem [resolvable:$true] %s37_s12 }
   0x8   :  { %v27_v3 = vrot.slane %v26_v2, 6 }
   0xa   :  { %v29_v4 = vsel %vm28_vm0, %v25_v1, %v27_v3 }
   0xb   :  { %31 = vst [vmem:[#allocation5] sm:$0xf] %v29_v4 }
   0xc   :  { %42 = dma.vmem_to_hbm [thread:$0]  %s38_s12, 64, %s40_s15, [#allocation4]  }
   0xd   :  { %101 = dma.done.wait [#allocation4], 64  }
   0xe   :  { %102 = vsyncadd [#allocation4], 4294967232 }
   0xf   :  { %47 = vsyncpa [#allocation3], 1 }
  0x10   :  { %48 = vsyncpa [#allocation4], 1 }

</bundles_post_ra>
